<compile_context>
chip_gen: v7x
topology: tpu7x:2x2x1
jax: 0.10.0
libtpu: 0.0.40
codegen_flags: <defaults>
</compile_context>

<pallas_src>
import jax
import jax.numpy as jnp
from jax.experimental import pallas as pl
from jax.experimental.pallas import tpu as pltpu

_EPS = 1e-5


# ----------------------------- Pallas kernel ---------------------------------
def _make_kernel(Cin, Cout, Ho, Wo, lanes, stride, use_projection):
    """Cin/Cout are sublane-padded channel counts; lanes = B_TILE * Ho * Wo."""
    TAPS = [(dh, dw) for dh in (-1, 0, 1) for dw in (-1, 0, 1)]

    def shifted_taps(act, mask_ref):
        # act: [C, lanes] f32 (C channels x (batch-tile * Ho*Wo) pixels).
        # Returns [9*C, lanes] bf16; tap t=(dh,dw) rows hold act[:, pix + dh*Wo + dw],
        # zeroed outside the image (same-padding semantics).  Cross-image wraparound
        # of the lane roll is exactly the masked-out region, so folding the batch
        # onto lanes is safe.  Pieces stay f32 (8-aligned); single bf16 cast after
        # the concat (dense pack, no per-piece sublane repack, no bf16 VPU work).
        pieces = []
        for t, (dh, dw) in enumerate(TAPS):
            delta = dh * Wo + dw
            if delta == 0:
                shifted = act
            else:
                shifted = pltpu.roll(act, shift=(-delta) % lanes, axis=1)
            if dh == 0 and dw == 0:
                pieces.append(shifted)                       # center tap: mask is all-ones
            else:
                pieces.append(shifted * mask_ref[t:t + 1, :])
        return jnp.concatenate(pieces, axis=0).astype(jnp.bfloat16)

    def body(x_ref, mask_ref, w1_ref, b1_ref, w2_ref, b2_ref,
             wsc_ref, bsc_ref, o_ref):
        # ---- conv1 (3x3, stride, pad 1) -> folded BN1 (scale in weights) -> ReLU ----
        if stride == 1:
            x = x_ref[0]                                     # [Cin, lanes] f32
            patch1 = shifted_taps(x, mask_ref)               # [9*Cin, lanes] bf16
        else:
            patch1 = x_ref[0]                                # [9*Cin, lanes] bf16 (wrapper-built taps)
        acc1 = jnp.dot(w1_ref[...], patch1, preferred_element_type=jnp.float32)
        out1 = jnp.maximum(acc1 + b1_ref[...], 0.0)          # [Cout, lanes] f32

        # ---- conv2 (3x3, stride 1, pad 1) -> folded BN2 (scale in weights) ----
        patch2 = shifted_taps(out1, mask_ref)                # [9*Cout, lanes] bf16
        out2 = jnp.dot(w2_ref[...], patch2, preferred_element_type=jnp.float32)
        out2 = out2 + b2_ref[...]

        # ---- shortcut ----
        if use_projection:
            if stride == 1:
                xs = x_ref[0].astype(jnp.bfloat16)           # [Cin, lanes]
            else:
                xs = x_ref[0][4 * Cin:5 * Cin, :]            # center tap == 1x1/stride-s samples (bf16)
            sc = jnp.dot(wsc_ref[...], xs, preferred_element_type=jnp.float32)
            sc = sc + bsc_ref[...]
        else:
            sc = x_ref[0]                                    # identity (Cin == Cout, stride == 1, f32)

        o_ref[...] = jnp.maximum(out2 + sc, 0.0)[None]       # [1, Cout, lanes]

    if use_projection:
        return body

    def body_identity(x_ref, mask_ref, w1_ref, b1_ref, w2_ref, b2_ref, o_ref):
        return body(x_ref, mask_ref, w1_ref, b1_ref, w2_ref, b2_ref,
                    None, None, o_ref)
    return body_identity


# ----------------------------- wrapper / glue ---------------------------------
def _round8(c):
    return ((c + 7) // 8) * 8


def _fold_bn(gamma, beta, mean, var, cpad):
    scale = gamma / jnp.sqrt(var + _EPS)
    bias = beta - mean * scale
    scale = jnp.pad(scale, (0, cpad - scale.shape[0]))
    bias = jnp.pad(bias, (0, cpad - bias.shape[0]))
    return (scale.reshape(-1, 1).astype(jnp.float32),
            bias.reshape(-1, 1).astype(jnp.float32))


def _pick_batch_tile(N, M, lane_target=512, lane_cap=8192):
    """Smallest divisor of N whose lane width (B_TILE*M) reaches lane_target,
    capped at lane_cap; keeps >= 2 grid points whenever N allows it."""
    best = 1
    for bt in range(1, N + 1):
        if N % bt == 0 and bt * M <= lane_cap:
            best = bt
            if bt * M >= lane_target:
                break
    return best


def prepare_basic_block(params, H, W, stride):
    """One-time (per-model) preprocessing: BN folding, BN-scale folding into the
    bf16 conv weights, weight reshaping, boundary-mask construction.  Hoisted out
    of the per-forward hot path."""
    w1 = params["w1"]                                        # [Cout, Cin, 3, 3]
    Cout, Cin = w1.shape[0], w1.shape[1]
    use_projection = (stride != 1) or (Cin != Cout)
    Ho = (H + 2 - 3) // stride + 1                           # PyTorch conv size (k=3, pad=1)
    Wo = (W + 2 - 3) // stride + 1
    M = Ho * Wo
    Cin_p, Cout_p = _round8(Cin), _round8(Cout)

    def fold_conv(w, cin_p, cout_p, scale):
        # [Co, Ci, 3, 3] -> [cout_p, 9*cin_p] with K index = (kh*3+kw)*cin_p + ci,
        # BN scale folded into the output rows, then one bf16 cast.
        co, ci = w.shape[0], w.shape[1]
        w = jnp.pad(w, ((0, cout_p - co), (0, cin_p - ci), (0, 0), (0, 0)))
        wf = jnp.transpose(w, (0, 2, 3, 1)).reshape(cout_p, 9 * cin_p)
        return (wf * scale).astype(jnp.bfloat16)

    s1, b1 = _fold_bn(*params["bn1"], Cout_p)
    s2, b2 = _fold_bn(*params["bn2"], Cout_p)
    prep = {
        "w1f": fold_conv(params["w1"], Cin_p, Cout_p, s1), "b1": b1,
        "w2f": fold_conv(params["w2"], Cout_p, Cout_p, s2), "b2": b2,
    }
    if use_projection:
        ssc, bsc = _fold_bn(*params["bnsc"], Cout_p)
        wsc = params["wsc"][:, :, 0, 0]                      # [Cout, Cin]
        wsc = jnp.pad(wsc, ((0, Cout_p - Cout), (0, Cin_p - Cin)))
        prep["wscf"] = (wsc * ssc).astype(jnp.bfloat16)
        prep["bsc"] = bsc

    # 0/1 boundary masks for the 9 shifted taps (row = tap index, col = pixel),
    # per single image; tiled along lanes per batch-tile at apply time.
    rows = jnp.arange(M, dtype=jnp.int32) // Wo
    cols = jnp.arange(M, dtype=jnp.int32) % Wo
    prep["mask"] = jnp.stack(
        [((rows + dh >= 0) & (rows + dh < Ho) &
          (cols + dw >= 0) & (cols + dw < Wo)).astype(jnp.float32)
         for dh in (-1, 0, 1) for dw in (-1, 0, 1)], axis=0)  # [9, M]

    meta = dict(Cin=Cin, Cout=Cout, Cin_p=Cin_p, Cout_p=Cout_p,
                H=H, W=W, Ho=Ho, Wo=Wo, stride=stride,
                use_projection=use_projection)
    return prep, meta


def basic_block_pallas(x_nchw, prep, meta):
    N = x_nchw.shape[0]
    Cin, Cout = meta["Cin"], meta["Cout"]
    Cin_p, Cout_p = meta["Cin_p"], meta["Cout_p"]
    Ho, Wo = meta["Ho"], meta["Wo"]
    stride, use_projection = meta["stride"], meta["use_projection"]
    M = Ho * Wo

    B_TILE = _pick_batch_tile(N, M)
    G = N // B_TILE
    lanes = B_TILE * M

    x = x_nchw.astype(jnp.float32)
    if Cin_p != Cin:
        x = jnp.pad(x, ((0, 0), (0, Cin_p - Cin), (0, 0), (0, 0)))

    if stride == 1:
        # [N, C, H*W] -> [G, C, B_TILE*M]: batch folded onto the lane axis.
        x_in = (x.reshape(G, B_TILE, Cin_p, M)
                  .transpose(0, 2, 1, 3).reshape(G, Cin_p, lanes))
        Cx = Cin_p
    else:
        # Strided tap decimation done wrapper-side (layout only) and shipped in
        # bf16: the kernel only consumes this tensor as an MXU operand.
        xpad = jnp.pad(x, ((0, 0), (0, 0), (1, 1), (1, 1)))
        taps = []
        for kh in range(3):
            for kw in range(3):
                t = jax.lax.slice(
                    xpad, (0, 0, kh, kw),
                    (N, Cin_p, kh + (Ho - 1) * stride + 1, kw + (Wo - 1) * stride + 1),
                    (1, 1, stride, stride))
                taps.append(t.reshape(N, Cin_p, M))
        x_in = jnp.concatenate(taps, axis=1).astype(jnp.bfloat16)   # [N, 9*Cin_p, M]
        Cx = 9 * Cin_p
        x_in = (x_in.reshape(G, B_TILE, Cx, M)
                    .transpose(0, 2, 1, 3).reshape(G, Cx, lanes))

    mask = jnp.tile(prep["mask"], (1, B_TILE))               # [9, lanes]

    def vec_spec(shape):
        return pl.BlockSpec(shape, lambda g: (0,) * len(shape))

    inputs = [x_in, mask, prep["w1f"], prep["b1"], prep["w2f"], prep["b2"]]
    in_specs = [
        pl.BlockSpec((1, Cx, lanes), lambda g: (g, 0, 0)),
        vec_spec((9, lanes)),
        vec_spec((Cout_p, 9 * Cin_p)), vec_spec((Cout_p, 1)),
        vec_spec((Cout_p, 9 * Cout_p)), vec_spec((Cout_p, 1)),
    ]
    if use_projection:
        inputs += [prep["wscf"], prep["bsc"]]
        in_specs += [vec_spec((Cout_p, Cin_p)), vec_spec((Cout_p, 1))]

    kernel = _make_kernel(Cin_p, Cout_p, Ho, Wo, lanes, stride, use_projection)

    out = pl.pallas_call(
        kernel,
        out_shape=jax.ShapeDtypeStruct((G, Cout_p, lanes), jnp.float32),
        grid=(G,),
        in_specs=in_specs,
        out_specs=pl.BlockSpec((1, Cout_p, lanes), lambda g: (g, 0, 0)),
        compiler_params=pltpu.CompilerParams(
            dimension_semantics=("parallel",),
            # Headroom for larger feature maps; tiny blocks at the demo sizes.
            vmem_limit_bytes=48 * 1024 * 1024),
    )(*inputs)

    # [G, Cout_p, B_TILE*M] -> NCHW
    out = (out.reshape(G, Cout_p, B_TILE, M)
              .transpose(0, 2, 1, 3).reshape(N, Cout_p, Ho, Wo))
    return out[:, :Cout]


# ----------------- pure-JAX reference (PyTorch eval-mode forward) -------------
def ref_basic_block(x, p, stride, use_projection):
    def conv(x, w, s, pad):
        return jax.lax.conv_general_dilated(
            x, w, (s, s), [(pad, pad), (pad, pad)],
            dimension_numbers=("NCHW", "OIHW", "NCHW"),
            precision=jax.lax.Precision.HIGHEST)

    def bn(x, gbmv):
        g, b, m, v = gbmv
        inv = g / jnp.sqrt(v + _EPS)
        return x * inv[None, :, None, None] + (b - m * inv)[None, :, None, None]

    out = jax.nn.relu(bn(conv(x, p["w1"], stride, 1), p["bn1"]))
    out = bn(conv(out, p["w2"], 1, 1), p["bn2"])
    sc = bn(conv(x, p["wsc"], stride, 0), p["bnsc"]) if use_projection else x
    return jax.nn.relu(out + sc)


def make_params(key, Cin, Cout, use_projection):
    ks = jax.random.split(key, 16)

    def bn_params(k0, k1, k2, k3):
        return (1.0 + 0.1 * jax.random.normal(ks[k0], (Cout,), jnp.float32),   # gamma
                0.1 * jax.random.normal(ks[k1], (Cout,), jnp.float32),         # beta
                0.1 * jax.random.normal(ks[k2], (Cout,), jnp.float32),         # running_mean
                0.5 + jax.random.uniform(ks[k3], (Cout,), jnp.float32))        # running_var

    p = {
        "w1": 0.2 * jax.random.normal(ks[0], (Cout, Cin, 3, 3), jnp.float32),
        "bn1": bn_params(1, 2, 3, 4),
        "w2": 0.2 * jax.random.normal(ks[5], (Cout, Cout, 3, 3), jnp.float32),
        "bn2": bn_params(6, 7, 8, 9),
    }
    if use_projection:
        p["wsc"] = 0.2 * jax.random.normal(ks[10], (Cout, Cin, 1, 1), jnp.float32)
        p["bnsc"] = bn_params(11, 12, 13, 14)
    return p


if __name__ == "__main__":
    key = jax.random.PRNGKey(0)
    N = 4                         # batch 4 -> B_TILE=2 (512 lanes/step) and 2 parallel grid points
    configs = [
        # (Cin, Cout, H, W, stride)
        (4, 8, 16, 16, 1),        # channel-change projection shortcut
        (8, 8, 16, 16, 1),        # identity shortcut
        (4, 8, 32, 32, 2),        # stride-2 downsample + projection shortcut
    ]
    for idx, (Cin, Cout, H, W, stride) in enumerate(configs):
        kx, kp = jax.random.split(jax.random.fold_in(key, idx))
        use_projection = (stride != 1) or (Cin != Cout)
        x = jax.random.normal(kx, (N, Cin, H, W), jnp.float32)
        params = make_params(kp, Cin, Cout, use_projection)

        # Per-model preprocessing hoisted out of the hot path.
        prep, meta = prepare_basic_block(params, H, W, stride)
        fwd = jax.jit(lambda xx, pp, _meta=meta: basic_block_pallas(xx, pp, _meta))

        y = jax.block_until_ready(fwd(x, prep))
        y_ref = ref_basic_block(x, params, stride, use_projection)
        assert y.shape == y_ref.shape, (y.shape, y_ref.shape)
        # bf16 MXU operands (with BN scale folded into the weights) vs f32/HIGHEST
        # reference -> allow ~1e-2-scale error.
        assert jnp.allclose(y, y_ref, atol=5e-2, rtol=5e-2), \
            float(jnp.max(jnp.abs(y - y_ref)))

    print("KERNEL_OK")
</pallas_src>

<mosaic_0001>
module attributes {stable_mosaic.version = 11 : i64} {
  func.func @body(%arg0: i32, %arg1: memref<1x8x512xf32, #tpu.memory_space<vmem>>, %arg2: memref<9x512xf32, #tpu.memory_space<vmem>>, %arg3: memref<8x72xbf16, #tpu.memory_space<vmem>>, %arg4: memref<8x1xf32, #tpu.memory_space<vmem>>, %arg5: memref<8x72xbf16, #tpu.memory_space<vmem>>, %arg6: memref<8x1xf32, #tpu.memory_space<vmem>>, %arg7: memref<8x8xbf16, #tpu.memory_space<vmem>>, %arg8: memref<8x1xf32, #tpu.memory_space<vmem>>, %arg9: memref<1x8x512xf32, #tpu.memory_space<vmem>>) attributes {dimension_semantics = [#tpu.dimension_semantics<parallel>], iteration_bounds = array<i64: 2>, scalar_prefetch = 0 : i64, scratch_operands = 0 : i64, tpu.core_type = #tpu.core_type<tc>, window_params = [{transform_indices = @transform_0, window_bounds = array<i64: 1, 8, 512>}, {pipeline_mode = #tpu.pipeline_mode<synchronous>, transform_indices = @transform_1, window_bounds = array<i64: 9, 512>}, {pipeline_mode = #tpu.pipeline_mode<synchronous>, transform_indices = @transform_2, window_bounds = array<i64: 8, 72>}, {pipeline_mode = #tpu.pipeline_mode<synchronous>, transform_indices = @transform_3, window_bounds = array<i64: 8, 1>}, {pipeline_mode = #tpu.pipeline_mode<synchronous>, transform_indices = @transform_4, window_bounds = array<i64: 8, 72>}, {pipeline_mode = #tpu.pipeline_mode<synchronous>, transform_indices = @transform_5, window_bounds = array<i64: 8, 1>}, {pipeline_mode = #tpu.pipeline_mode<synchronous>, transform_indices = @transform_6, window_bounds = array<i64: 8, 8>}, {pipeline_mode = #tpu.pipeline_mode<synchronous>, transform_indices = @transform_7, window_bounds = array<i64: 8, 1>}, {transform_indices = @transform_8, window_bounds = array<i64: 1, 8, 512>}]} {
    %c0 = arith.constant 0 : index
    %c0_0 = arith.constant 0 : index
    %c0_1 = arith.constant 0 : index
    %0 = vector.load %arg1[%c0, %c0_0, %c0_1] : memref<1x8x512xf32, #tpu.memory_space<vmem>>, vector<1x8x512xf32>
    %1 = vector.shape_cast %0 : vector<1x8x512xf32> to vector<8x512xf32>
    %c17_i32 = arith.constant 17 : i32
    %2 = tpu.dynamic_rotate %1 by %c17_i32 dim 1 : vector<8x512xf32>, i32 -> vector<8x512xf32>
    %c0_2 = arith.constant 0 : index
    %c0_3 = arith.constant 0 : index
    %3 = vector.load %arg2[%c0_2, %c0_3] : memref<9x512xf32, #tpu.memory_space<vmem>>, vector<1x512xf32>
    %4 = vector.broadcast %3 : vector<1x512xf32> to vector<8x512xf32>
    %5 = arith.mulf %2, %4 : vector<8x512xf32>
    %c16_i32 = arith.constant 16 : i32
    %6 = tpu.dynamic_rotate %1 by %c16_i32 dim 1 : vector<8x512xf32>, i32 -> vector<8x512xf32>
    %c1 = arith.constant 1 : index
    %c0_4 = arith.constant 0 : index
    %7 = vector.load %arg2[%c1, %c0_4] : memref<9x512xf32, #tpu.memory_space<vmem>>, vector<1x512xf32>
    %8 = vector.broadcast %7 : vector<1x512xf32> to vector<8x512xf32>
    %9 = arith.mulf %6, %8 : vector<8x512xf32>
    %c15_i32 = arith.constant 15 : i32
    %10 = tpu.dynamic_rotate %1 by %c15_i32 dim 1 : vector<8x512xf32>, i32 -> vector<8x512xf32>
    %c2 = arith.constant 2 : index
    %c0_5 = arith.constant 0 : index
    %11 = vector.load %arg2[%c2, %c0_5] : memref<9x512xf32, #tpu.memory_space<vmem>>, vector<1x512xf32>
    %12 = vector.broadcast %11 : vector<1x512xf32> to vector<8x512xf32>
    %13 = arith.mulf %10, %12 : vector<8x512xf32>
    %c1_i32 = arith.constant 1 : i32
    %14 = tpu.dynamic_rotate %1 by %c1_i32 dim 1 : vector<8x512xf32>, i32 -> vector<8x512xf32>
    %c3 = arith.constant 3 : index
    %c0_6 = arith.constant 0 : index
    %15 = vector.load %arg2[%c3, %c0_6] : memref<9x512xf32, #tpu.memory_space<vmem>>, vector<1x512xf32>
    %16 = vector.broadcast %15 : vector<1x512xf32> to vector<8x512xf32>
    %17 = arith.mulf %14, %16 : vector<8x512xf32>
    %c511_i32 = arith.constant 511 : i32
    %18 = tpu.dynamic_rotate %1 by %c511_i32 dim 1 : vector<8x512xf32>, i32 -> vector<8x512xf32>
    %c5 = arith.constant 5 : index
    %c0_7 = arith.constant 0 : index
    %19 = vector.load %arg2[%c5, %c0_7] : memref<9x512xf32, #tpu.memory_space<vmem>>, vector<1x512xf32>
    %20 = vector.broadcast %19 : vector<1x512xf32> to vector<8x512xf32>
    %21 = arith.mulf %18, %20 : vector<8x512xf32>
    %c497_i32 = arith.constant 497 : i32
    %22 = tpu.dynamic_rotate %1 by %c497_i32 dim 1 : vector<8x512xf32>, i32 -> vector<8x512xf32>
    %c6 = arith.constant 6 : index
    %c0_8 = arith.constant 0 : index
    %23 = vector.load %arg2[%c6, %c0_8] : memref<9x512xf32, #tpu.memory_space<vmem>>, vector<1x512xf32>
    %24 = vector.broadcast %23 : vector<1x512xf32> to vector<8x512xf32>
    %25 = arith.mulf %22, %24 : vector<8x512xf32>
    %c496_i32 = arith.constant 496 : i32
    %26 = tpu.dynamic_rotate %1 by %c496_i32 dim 1 : vector<8x512xf32>, i32 -> vector<8x512xf32>
    %c7 = arith.constant 7 : index
    %c0_9 = arith.constant 0 : index
    %27 = vector.load %arg2[%c7, %c0_9] : memref<9x512xf32, #tpu.memory_space<vmem>>, vector<1x512xf32>
    %28 = vector.broadcast %27 : vector<1x512xf32> to vector<8x512xf32>
    %29 = arith.mulf %26, %28 : vector<8x512xf32>
    %c495_i32 = arith.constant 495 : i32
    %30 = tpu.dynamic_rotate %1 by %c495_i32 dim 1 : vector<8x512xf32>, i32 -> vector<8x512xf32>
    %c8 = arith.constant 8 : index
    %c0_10 = arith.constant 0 : index
    %31 = vector.load %arg2[%c8, %c0_10] : memref<9x512xf32, #tpu.memory_space<vmem>>, vector<1x512xf32>
    %32 = vector.broadcast %31 : vector<1x512xf32> to vector<8x512xf32>
    %33 = arith.mulf %30, %32 : vector<8x512xf32>
    %34 = tpu.concatenate %5, %9, %13, %17, %1, %21, %25, %29, %33 in 0 : vector<8x512xf32>, vector<8x512xf32>, vector<8x512xf32>, vector<8x512xf32>, vector<8x512xf32>, vector<8x512xf32>, vector<8x512xf32>, vector<8x512xf32>, vector<8x512xf32> -> vector<72x512xf32>
    %35 = arith.truncf %34 : vector<72x512xf32> to vector<72x512xbf16>
    %c0_11 = arith.constant 0 : index
    %c0_12 = arith.constant 0 : index
    %36 = vector.load %arg3[%c0_11, %c0_12] : memref<8x72xbf16, #tpu.memory_space<vmem>>, vector<8x72xbf16>
    %cst = arith.constant dense<0.000000e+00> : vector<8x512xf32>
    %37 = tpu.matmul %36, %35, %cst {dimension_numbers = #tpu.dot_dimension_numbers<[1], [0], [0], [1], [0, 0, 1, 1], [], []>} : vector<8x72xbf16>, vector<72x512xbf16>, vector<8x512xf32> -> vector<8x512xf32>
    %c0_13 = arith.constant 0 : index
    %c0_14 = arith.constant 0 : index
    %38 = vector.load %arg4[%c0_13, %c0_14] : memref<8x1xf32, #tpu.memory_space<vmem>>, vector<8x1xf32>
    %39 = vector.broadcast %38 : vector<8x1xf32> to vector<8x512xf32>
    %40 = arith.addf %37, %39 : vector<8x512xf32>
    %cst_15 = arith.constant 0.000000e+00 : f32
    %41 = vector.broadcast %cst_15 : f32 to vector<8x512xf32>
    %42 = arith.maximumf %40, %41 : vector<8x512xf32>
    %c17_i32_16 = arith.constant 17 : i32
    %43 = tpu.dynamic_rotate %42 by %c17_i32_16 dim 1 : vector<8x512xf32>, i32 -> vector<8x512xf32>
    %c0_17 = arith.constant 0 : index
    %c0_18 = arith.constant 0 : index
    %44 = vector.load %arg2[%c0_17, %c0_18] : memref<9x512xf32, #tpu.memory_space<vmem>>, vector<1x512xf32>
    %45 = vector.broadcast %44 : vector<1x512xf32> to vector<8x512xf32>
    %46 = arith.mulf %43, %45 : vector<8x512xf32>
    %c16_i32_19 = arith.constant 16 : i32
    %47 = tpu.dynamic_rotate %42 by %c16_i32_19 dim 1 : vector<8x512xf32>, i32 -> vector<8x512xf32>
    %c1_20 = arith.constant 1 : index
    %c0_21 = arith.constant 0 : index
    %48 = vector.load %arg2[%c1_20, %c0_21] : memref<9x512xf32, #tpu.memory_space<vmem>>, vector<1x512xf32>
    %49 = vector.broadcast %48 : vector<1x512xf32> to vector<8x512xf32>
    %50 = arith.mulf %47, %49 : vector<8x512xf32>
    %c15_i32_22 = arith.constant 15 : i32
    %51 = tpu.dynamic_rotate %42 by %c15_i32_22 dim 1 : vector<8x512xf32>, i32 -> vector<8x512xf32>
    %c2_23 = arith.constant 2 : index
    %c0_24 = arith.constant 0 : index
    %52 = vector.load %arg2[%c2_23, %c0_24] : memref<9x512xf32, #tpu.memory_space<vmem>>, vector<1x512xf32>
    %53 = vector.broadcast %52 : vector<1x512xf32> to vector<8x512xf32>
    %54 = arith.mulf %51, %53 : vector<8x512xf32>
    %c1_i32_25 = arith.constant 1 : i32
    %55 = tpu.dynamic_rotate %42 by %c1_i32_25 dim 1 : vector<8x512xf32>, i32 -> vector<8x512xf32>
    %c3_26 = arith.constant 3 : index
    %c0_27 = arith.constant 0 : index
    %56 = vector.load %arg2[%c3_26, %c0_27] : memref<9x512xf32, #tpu.memory_space<vmem>>, vector<1x512xf32>
    %57 = vector.broadcast %56 : vector<1x512xf32> to vector<8x512xf32>
    %58 = arith.mulf %55, %57 : vector<8x512xf32>
    %c511_i32_28 = arith.constant 511 : i32
    %59 = tpu.dynamic_rotate %42 by %c511_i32_28 dim 1 : vector<8x512xf32>, i32 -> vector<8x512xf32>
    %c5_29 = arith.constant 5 : index
    %c0_30 = arith.constant 0 : index
    %60 = vector.load %arg2[%c5_29, %c0_30] : memref<9x512xf32, #tpu.memory_space<vmem>>, vector<1x512xf32>
    %61 = vector.broadcast %60 : vector<1x512xf32> to vector<8x512xf32>
    %62 = arith.mulf %59, %61 : vector<8x512xf32>
    %c497_i32_31 = arith.constant 497 : i32
    %63 = tpu.dynamic_rotate %42 by %c497_i32_31 dim 1 : vector<8x512xf32>, i32 -> vector<8x512xf32>
    %c6_32 = arith.constant 6 : index
    %c0_33 = arith.constant 0 : index
    %64 = vector.load %arg2[%c6_32, %c0_33] : memref<9x512xf32, #tpu.memory_space<vmem>>, vector<1x512xf32>
    %65 = vector.broadcast %64 : vector<1x512xf32> to vector<8x512xf32>
    %66 = arith.mulf %63, %65 : vector<8x512xf32>
    %c496_i32_34 = arith.constant 496 : i32
    %67 = tpu.dynamic_rotate %42 by %c496_i32_34 dim 1 : vector<8x512xf32>, i32 -> vector<8x512xf32>
    %c7_35 = arith.constant 7 : index
    %c0_36 = arith.constant 0 : index
    %68 = vector.load %arg2[%c7_35, %c0_36] : memref<9x512xf32, #tpu.memory_space<vmem>>, vector<1x512xf32>
    %69 = vector.broadcast %68 : vector<1x512xf32> to vector<8x512xf32>
    %70 = arith.mulf %67, %69 : vector<8x512xf32>
    %c495_i32_37 = arith.constant 495 : i32
    %71 = tpu.dynamic_rotate %42 by %c495_i32_37 dim 1 : vector<8x512xf32>, i32 -> vector<8x512xf32>
    %c8_38 = arith.constant 8 : index
    %c0_39 = arith.constant 0 : index
    %72 = vector.load %arg2[%c8_38, %c0_39] : memref<9x512xf32, #tpu.memory_space<vmem>>, vector<1x512xf32>
    %73 = vector.broadcast %72 : vector<1x512xf32> to vector<8x512xf32>
    %74 = arith.mulf %71, %73 : vector<8x512xf32>
    %75 = tpu.concatenate %46, %50, %54, %58, %42, %62, %66, %70, %74 in 0 : vector<8x512xf32>, vector<8x512xf32>, vector<8x512xf32>, vector<8x512xf32>, vector<8x512xf32>, vector<8x512xf32>, vector<8x512xf32>, vector<8x512xf32>, vector<8x512xf32> -> vector<72x512xf32>
    %76 = arith.truncf %75 : vector<72x512xf32> to vector<72x512xbf16>
    %c0_40 = arith.constant 0 : index
    %c0_41 = arith.constant 0 : index
    %77 = vector.load %arg5[%c0_40, %c0_41] : memref<8x72xbf16, #tpu.memory_space<vmem>>, vector<8x72xbf16>
    %cst_42 = arith.constant dense<0.000000e+00> : vector<8x512xf32>
    %78 = tpu.matmul %77, %76, %cst_42 {dimension_numbers = #tpu.dot_dimension_numbers<[1], [0], [0], [1], [0, 0, 1, 1], [], []>} : vector<8x72xbf16>, vector<72x512xbf16>, vector<8x512xf32> -> vector<8x512xf32>
    %c0_43 = arith.constant 0 : index
    %c0_44 = arith.constant 0 : index
    %79 = vector.load %arg6[%c0_43, %c0_44] : memref<8x1xf32, #tpu.memory_space<vmem>>, vector<8x1xf32>
    %80 = vector.broadcast %79 : vector<8x1xf32> to vector<8x512xf32>
    %81 = arith.addf %78, %80 : vector<8x512xf32>
    %c0_45 = arith.constant 0 : index
    %c0_46 = arith.constant 0 : index
    %c0_47 = arith.constant 0 : index
    %82 = vector.load %arg1[%c0_45, %c0_46, %c0_47] : memref<1x8x512xf32, #tpu.memory_space<vmem>>, vector<1x8x512xf32>
    %83 = vector.shape_cast %82 : vector<1x8x512xf32> to vector<8x512xf32>
    %84 = arith.truncf %83 : vector<8x512xf32> to vector<8x512xbf16>
    %c0_48 = arith.constant 0 : index
    %c0_49 = arith.constant 0 : index
    %85 = vector.load %arg7[%c0_48, %c0_49] : memref<8x8xbf16, #tpu.memory_space<vmem>>, vector<8x8xbf16>
    %cst_50 = arith.constant dense<0.000000e+00> : vector<8x512xf32>
    %86 = tpu.matmul %85, %84, %cst_50 {dimension_numbers = #tpu.dot_dimension_numbers<[1], [0], [0], [1], [0, 0, 1, 1], [], []>} : vector<8x8xbf16>, vector<8x512xbf16>, vector<8x512xf32> -> vector<8x512xf32>
    %c0_51 = arith.constant 0 : index
    %c0_52 = arith.constant 0 : index
    %87 = vector.load %arg8[%c0_51, %c0_52] : memref<8x1xf32, #tpu.memory_space<vmem>>, vector<8x1xf32>
    %88 = vector.broadcast %87 : vector<8x1xf32> to vector<8x512xf32>
    %89 = arith.addf %86, %88 : vector<8x512xf32>
    %90 = arith.addf %81, %89 : vector<8x512xf32>
    %cst_53 = arith.constant 0.000000e+00 : f32
    %91 = vector.broadcast %cst_53 : f32 to vector<8x512xf32>
    %92 = arith.maximumf %90, %91 : vector<8x512xf32>
    %93 = vector.shape_cast %92 : vector<8x512xf32> to vector<1x8x512xf32>
    %c0_54 = arith.constant 0 : index
    %c0_55 = arith.constant 0 : index
    %c0_56 = arith.constant 0 : index
    %94 = vector.load %arg9[%c0_54, %c0_55, %c0_56] : memref<1x8x512xf32, #tpu.memory_space<vmem>>, vector<1x8x512xf32>
    tpu.vector_store %arg9[%c0_54, %c0_55, %c0_56], %93 {strides = array<i32>} : memref<1x8x512xf32, #tpu.memory_space<vmem>>, vector<1x8x512xf32>,
    return
  }
  func.func @transform_0(%arg0: i32) -> (i32, i32, i32) {
    %c0_i32 = arith.constant 0 : i32
    %c0_i32_0 = arith.constant 0 : i32
    %c0_i32_1 = arith.constant 0 : i32
    return %arg0, %c0_i32, %c0_i32_0 : i32, i32, i32
  }
  func.func @transform_1(%arg0: i32) -> (i32, i32) {
    %c0_i32 = arith.constant 0 : i32
    %c0_i32_0 = arith.constant 0 : i32
    %c0_i32_1 = arith.constant 0 : i32
    return %c0_i32, %c0_i32_0 : i32, i32
  }
  func.func @transform_2(%arg0: i32) -> (i32, i32) {
    %c0_i32 = arith.constant 0 : i32
    %c0_i32_0 = arith.constant 0 : i32
    %c0_i32_1 = arith.constant 0 : i32
    return %c0_i32, %c0_i32_0 : i32, i32
  }
  func.func @transform_3(%arg0: i32) -> (i32, i32) {
    %c0_i32 = arith.constant 0 : i32
    %c0_i32_0 = arith.constant 0 : i32
    %c0_i32_1 = arith.constant 0 : i32
    return %c0_i32, %c0_i32_0 : i32, i32
  }
  func.func @transform_4(%arg0: i32) -> (i32, i32) {
    %c0_i32 = arith.constant 0 : i32
    %c0_i32_0 = arith.constant 0 : i32
    %c0_i32_1 = arith.constant 0 : i32
    return %c0_i32, %c0_i32_0 : i32, i32
  }
  func.func @transform_5(%arg0: i32) -> (i32, i32) {
    %c0_i32 = arith.constant 0 : i32
    %c0_i32_0 = arith.constant 0 : i32
    %c0_i32_1 = arith.constant 0 : i32
    return %c0_i32, %c0_i32_0 : i32, i32
  }
  func.func @transform_6(%arg0: i32) -> (i32, i32) {
    %c0_i32 = arith.constant 0 : i32
    %c0_i32_0 = arith.constant 0 : i32
    %c0_i32_1 = arith.constant 0 : i32
    return %c0_i32, %c0_i32_0 : i32, i32
  }
  func.func @transform_7(%arg0: i32) -> (i32, i32) {
    %c0_i32 = arith.constant 0 : i32
    %c0_i32_0 = arith.constant 0 : i32
    %c0_i32_1 = arith.constant 0 : i32
    return %c0_i32, %c0_i32_0 : i32, i32
  }
  func.func @transform_8(%arg0: i32) -> (i32, i32, i32) {
    %c0_i32 = arith.constant 0 : i32
    %c0_i32_0 = arith.constant 0 : i32
    %c0_i32_1 = arith.constant 0 : i32
    return %arg0, %c0_i32, %c0_i32_0 : i32, i32, i32
  }
}

</mosaic_0001>

<bundles_post_ra>
// kernel: _lambda_.1
= control target key start
LH: loop header
LB: loop body
LE: loop exit
PB: predicated region body
PF: predicated region fallthrough
CT: control target
= control target key end

     0   :  { %s1319_s27 = smov 0   ;;  %s1875_s0 = inlined_call_operand.vmem [shape: f32[2,8,512], index: 0, kind: input, shape index: {}]   ;;  %s1876_s1 = inlined_call_operand.vmem [shape: f32[9,512], index: 1, kind: input, shape index: {}]   ;;  %s1877_s2 = inlined_call_operand.vmem [shape: bf16[8,72], index: 2, kind: input, shape index: {}]   ;;  %s1878_s3 = inlined_call_operand.vmem [shape: f32[8,1], index: 3, kind: input, shape index: {}]   ;;  %s1879_s4 = inlined_call_operand.vmem [shape: bf16[8,72], index: 4, kind: input, shape index: {}]   ;;  %s1880_s5 = inlined_call_operand.vmem [shape: f32[8,1], index: 5, kind: input, shape index: {}]   ;;  %s1881_s6 = inlined_call_operand.vmem [shape: bf16[8,8], index: 6, kind: input, shape index: {}]   ;;  %s1882_s7 = inlined_call_operand.vmem [shape: f32[8,1], index: 7, kind: input, shape index: {}]   ;;  %s1883_s8 = inlined_call_operand.vmem [shape: f32[2,8,512], index: 8, kind: output, shape index: {}]  }
   0x1 LB: > { %s1190_s28 = sadd.s32 4294967295, %s1263_s27   ;;  %p1194_p0 = scmp.ge.s32.totalorder %s1263_s27, 1  ;;  %s1263_s27 = sphi %s1319_s27, %s18_s27  }
   0x2   : > { %p262_p1 = scmp.lt.s32.totalorder %s1263_s27, 3 }
   0x4   : > { %p263_p2 = pnand %p1194_p0, %p262_p1 }
   0x5   : > { %p296_p3 = scmp.lt.s32.totalorder (!%p263_p2), %s1190_s28, 1  ;;  %s1265_s11 = smov (!%p263_p2), 17   ;;  %v1272_v4 = vmov (!%p263_p2), 0   ;;  %v653_v5 = vld [vmem:[%s1878_s3] sm:$0xff] (!%p263_p2)  ;;  %v319_v6 = vlaneseq (!%p263_p2)  ;;  %vm663_vm8 = vcmask (!%p263_p2), 1043456   ;;  %vm659_vm9 = vcmask (!%p263_p2), 588800  }
   0x6   : > { %266 = sbr.rel (%p263_p2) target bundleno = 835 (0x343), region = 52  ;;  %s1266_s12 = smov (!%p263_p2), 16   ;;  %708 = vmatprep.mubr.bf16.mxu0 (!%p263_p2), %v1272_v4  ;;  %749 = vmatprep.mubr.bf16.mxu1 (!%p263_p2), %v1272_v4  ;;  %v326_v12 = vld [vmem:[%s1876_s1] ss:$8 sm:$0xf] (!%p263_p2)  ;;  %vm1025_vm10 = vcmask (!%p263_p2), 64512  }
   0x7   : > { %s1267_s13 = smov (!%p263_p2), 15   ;;  %s1268_s14 = smov (!%p263_p2), 1   ;;  %1255 = vset.pattern.permute.xlu0 (!%p263_p2), %v1272_v4  ;;  %1256 = vset.pattern.permute.xlu1 (!%p263_p2), %v1272_v4  ;;  %v329_v7 = vshrl.u32 (!%p263_p2), %v319_v6, 7  ;;  %v1414_v10 = vand.u32 (!%p263_p2), 127, %v319_v6 }
   0x8   : > { %s1269_s15 = smov (!%p263_p2), 127   ;;  %s1270_s16 = smov (!%p263_p2), 113   ;;  %v1199_v13 = vld [vmem:[%s1876_s1 + $0x1] ss:$8 sm:$0xf] (!%p263_p2) }
   0x9   : > { %s1271_s17 = smov (!%p263_p2), 112   ;;  %s1273_s18 = smov (!%p263_p2), 111   ;;  %v1416_v11 = vsub.s32 (!%p263_p2), 1, %v329_v7  ;;  %vm321_vm0 = vcmp.lt.s32.totalorder (!%p263_p2), %v1414_v10, 17  ;;  %v1425_v14 = vsub.s32 (!%p263_p2), 0, %v329_v7  ;;  %v1427_v16 = vsub.s32 (!%p263_p2), 2, %v329_v7 }
   0xa   : > { %v1429_v18 = vsub.s32 (!%p263_p2), 3, %v329_v7  ;;  %vm360_vm1 = vcmp.lt.s32.totalorder (!%p263_p2), %v1414_v10, 16  ;;  %v1200_v53 = vld [vmem:[%s1876_s1 + $0x2] ss:$8 sm:$0xf] (!%p263_p2)  ;;  %vm400_vm2 = vcmp.lt.s32.totalorder (!%p263_p2), %v1414_v10, 15 }
   0xb   : > { %v1433_v19 = vrot.slane (!%p263_p2), %v326_v12, %v1416_v11  ;;  %v1436_v20 = vrot.slane (!%p263_p2), %v1199_v13, %v1416_v11  ;;  %v1441_v22 = vrot.slane (!%p263_p2), %v326_v12, %v1425_v14  ;;  %v1444_v23 = vrot.slane (!%p263_p2), %v326_v12, %v1427_v16  ;;  %v1201_v54 = vld [vmem:[%s1876_s1 + $0x3] ss:$8 sm:$0xf] (!%p263_p2) }
   0xc   : > { %v1447_v26 = vrot.slane (!%p263_p2), %v1199_v13, %v1425_v14  ;;  %v1454_v29 = vrot.slane (!%p263_p2), %v1199_v13, %v1427_v16  ;;  %v1457_v30 = vrot.slane (!%p263_p2), %v326_v12, %v1429_v18  ;;  %v1464_v34 = vrot.slane (!%p263_p2), %v1199_v13, %v1429_v18 }
   0xd   : > { %s1885_s28 = smov (!%p296_p3, %s1190_s28), 1  ;;  %v1488_v57 = vrot.slane %v1200_v53, %v1416_v11  ;;  %vm440_vm3 = vcmp.lt.s32.totalorder %v1414_v10, 1  ;;  %v1492_v58 = vrot.slane %v1201_v54, %v1416_v11  ;;  %v1497_v60 = vrot.slane %v1200_v53, %v1425_v14 }
   0xe   : > { %s1220_s29 = sshll.u32 %s1885_s28, 5  ;;  %v1500_v61 = vrot.slane %v1200_v53, %v1427_v16  ;;  %v1503_v62 = vrot.slane %v1200_v53, %v1429_v18  ;;  %vm480_vm4 = vcmp.lt.s32.totalorder %v1414_v10, 127  ;;  %vm560_vm5 = vcmp.lt.s32.totalorder %v1414_v10, 112 }
   0xf   : > { %s300_s10 = scalar_lea.vmem %s1875_s0, %s1220_s29  ;;  %vm520_vm6 = vcmp.lt.s32.totalorder %v1414_v10, 113  ;;  %vm600_vm7 = vcmp.lt.s32.totalorder %v1414_v10, 111  ;;  %s305_s19 = scalar_lea.vmem %s1883_s8, %s1220_s29 }
  0x10   : > { %v1335_v0 = vld [vmem:[%s300_s10 + $0x10] sm:$0xff]  ;;  %v1337_v1 = vld [vmem:[%s300_s10] sm:$0xff]  ;;  %v1343_v2 = vld [vmem:[%s300_s10 + $0x18] sm:$0xff] }
  0x11   : > { %315 = vrot.lane.b32.xlu1 %v1335_v0, %s1265_s11  ;;  %311 = vrot.lane.b32.xlu0 %v1337_v1, %s1265_s11  ;;  %v1345_v3 = vld [vmem:[%s300_s10 + $0x8] sm:$0xff] }
  0x15   : > { %317 = vrot.lane.b32.xlu1 %v1343_v2, %s1265_s11  ;;  %313 = vrot.lane.b32.xlu0 %v1345_v3, %s1265_s11 }
  0x19   : > { %354 = vrot.lane.b32.xlu1 %v1345_v3, %s1266_s12  ;;  %352 = vrot.lane.b32.xlu0 %v1337_v1, %s1266_s12 }
  0x1d   : > { %358 = vrot.lane.b32.xlu1 %v1343_v2, %s1266_s12  ;;  %356 = vrot.lane.b32.xlu0 %v1335_v0, %s1266_s12 }
  0x21   : > { %394 = vrot.lane.b32.xlu1 %v1345_v3, %s1267_s13  ;;  %392 = vrot.lane.b32.xlu0 %v1337_v1, %s1267_s13 }
  0x25   : > { %398 = vrot.lane.b32.xlu1 %v1343_v2, %s1267_s13  ;;  %396 = vrot.lane.b32.xlu0 %v1335_v0, %s1267_s13 }
  0x29   : > { %434 = vrot.lane.b32.xlu1 %v1345_v3, %s1268_s14  ;;  %432 = vrot.lane.b32.xlu0 %v1337_v1, %s1268_s14 }
  0x2d   : > { %438 = vrot.lane.b32.xlu1 %v1343_v2, %s1268_s14  ;;  %436 = vrot.lane.b32.xlu0 %v1335_v0, %s1268_s14 }
  0x31   : > { %474 = vrot.lane.b32.xlu1 %v1345_v3, %s1269_s15  ;;  %472 = vrot.lane.b32.xlu0 %v1337_v1, %s1269_s15 }
  0x35   : > { %478 = vrot.lane.b32.xlu1 %v1343_v2, %s1269_s15  ;;  %476 = vrot.lane.b32.xlu0 %v1335_v0, %s1269_s15 }
  0x39   : > { %514 = vrot.lane.b32.xlu1 %v1345_v3, %s1270_s16  ;;  %512 = vrot.lane.b32.xlu0 %v1337_v1, %s1270_s16 }
  0x3d   : > { %518 = vrot.lane.b32.xlu1 %v1343_v2, %s1270_s16  ;;  %516 = vrot.lane.b32.xlu0 %v1335_v0, %s1270_s16 }
  0x41   : > { %554 = vrot.lane.b32.xlu1 %v1345_v3, %s1271_s17  ;;  %552 = vrot.lane.b32.xlu0 %v1337_v1, %s1271_s17 }
  0x45   : > { %558 = vrot.lane.b32.xlu1 %v1343_v2, %s1271_s17  ;;  %556 = vrot.lane.b32.xlu0 %v1335_v0, %s1271_s17 }
  0x49   : > { %594 = vrot.lane.b32.xlu1 %v1345_v3, %s1273_s18  ;;  %592 = vrot.lane.b32.xlu0 %v1337_v1, %s1273_s18 }
  0x4d   : > { %598 = vrot.lane.b32.xlu1 %v1343_v2, %s1273_s18  ;;  %596 = vrot.lane.b32.xlu0 %v1335_v0, %s1273_s18 }
  0x51   : > { %656 = vperm.xlu0 %1255, %v653_v5  }
  0x83   : > { %v316_v8 = vpop.permute.xlu1 %315  ;;  %v312_v9 = vpop.permute.xlu0 %311 }
  0x87   : > { %v318_v15 = vpop.permute.xlu1 %317  ;;  %v314_v17 = vpop.permute.xlu0 %313 }
  0x88   : > { %v324_v21 = vsel %vm321_vm0, %v312_v9, %v314_v17  ;;  %v325_v27 = vsel %vm321_vm0, %v318_v15, %v312_v9  ;;  %v323_v31 = vsel %vm321_vm0, %v314_v17, %v316_v8  ;;  %v322_v35 = vsel %vm321_vm0, %v316_v8, %v318_v15 }
  0x89   : > { %v349_v32 = vmul.f32 %v1433_v19, %v324_v21  ;;  %v348_v36 = vmul.f32 %v1441_v22, %v325_v27  ;;  %v350_v40 = vmul.f32 %v1444_v23, %v323_v31  ;;  %v351_v46 = vmul.f32 %v1457_v30, %v322_v35 }
  0x8a   : > { %v1510_v8 = vrot.slane %v1201_v54, %v1425_v14  ;;  %v1513_v9 = vrot.slane %v1201_v54, %v1427_v16  ;;  %v1520_v17 = vrot.slane %v1201_v54, %v1429_v18 }
  0x8b   : > { %v355_v24 = vpop.permute.xlu1 %354  ;;  %v353_v25 = vpop.permute.xlu0 %352 }
  0x8c   : > { %v363_v28 = vsel %vm360_vm1, %v353_v25, %v355_v24 }
  0x8d   : > { %v389_v33 = vmul.f32 %v1436_v20, %v363_v28 }
  0x8f   : > { %v359_v37 = vpop.permute.xlu1 %358  ;;  %v357_v38 = vpop.permute.xlu0 %356  ;;  %v633_v39 = vpack.c.bf16 %v389_v33, %v349_v32 }
  0x90   : > { %v364_v41 = vsel %vm360_vm1, %v359_v37, %v353_v25  ;;  %v361_v42 = vsel %vm360_vm1, %v357_v38, %v359_v37  ;;  %v362_v43 = vsel %vm360_vm1, %v355_v24, %v357_v38 }
  0x91   : > { %v388_v44 = vmul.f32 %v1447_v26, %v364_v41  ;;  %v390_v45 = vmul.f32 %v1454_v29, %v362_v43  ;;  %676 = vmatprep.subr.bf16.mxu0 %v633_v39  ;;  %v391_v47 = vmul.f32 %v1464_v34, %v361_v42 }
  0x93   : > { %v395_v48 = vpop.permute.xlu1 %394  ;;  %v393_v49 = vpop.permute.xlu0 %392  ;;  %v632_v50 = vpack.c.bf16 %v388_v44, %v348_v36  ;;  %v635_v51 = vpack.c.bf16 %v391_v47, %v351_v46  ;;  %v634_v52 = vpack.c.bf16 %v390_v45, %v350_v40  ;;  %v1202_v40 = vld [vmem:[%s1876_s1 + $0x5] ss:$8 sm:$0xf] }
  0x94   : > { %v403_v59 = vsel %vm400_vm2, %v393_v49, %v395_v48  ;;  %v1541_v46 = vrot.slane %v1202_v40, %v1425_v14  ;;  %v1544_v47 = vrot.slane %v1202_v40, %v1429_v18 }
  0x95   : > { %677 = vmatpush1.bf16.msra.mxu0 %v632_v50  ;;  %717 = vmatprep.subr.bf16.mxu1 %v635_v51  ;;  %v429_v12 = vmul.f32 %v1488_v57, %v403_v59  ;;  %v1552_v50 = vrot.slane %v1202_v40, %v1427_v16 }
  0x96   : > { %718 = vmatpush1.bf16.msra.mxu1 %v634_v52 }
  0x97   : > { %v399_v55 = vpop.permute.xlu1 %398  ;;  %v397_v56 = vpop.permute.xlu0 %396 }
  0x98   : > { %v404_v6 = vsel %vm400_vm2, %v399_v55, %v393_v49  ;;  %v402_v13 = vsel %vm400_vm2, %v395_v48, %v397_v56  ;;  %v401_v21 = vsel %vm400_vm2, %v397_v56, %v399_v55  ;;  %v1549_v49 = vrot.slane %v1202_v40, %v1416_v11  ;;  %v1205_v40 = vld [vmem:[%s1876_s1 + $0x20] ss:$8 sm:$0xf] }
  0x99   : > { %v428_v24 = vmul.f32 %v1497_v60, %v404_v6  ;;  %v430_v31 = vmul.f32 %v1500_v61, %v402_v13  ;;  %v431_v36 = vmul.f32 %v1503_v62, %v401_v21 }
  0x9b   : > { %v435_v63 = vpop.permute.xlu1 %434  ;;  %v433_v5 = vpop.permute.xlu0 %432 }
  0x9c   : > { %v443_v7 = vsel %vm440_vm3, %v433_v5, %v435_v63 }
  0x9d   : > { %v469_v15 = vmul.f32 %v1492_v58, %v443_v7 }
  0x9f   : > { %v439_v25 = vpop.permute.xlu1 %438  ;;  %v437_v27 = vpop.permute.xlu0 %436  ;;  %v637_v28 = vpack.c.bf16 %v469_v15, %v429_v12 }
  0xa0   : > { %v444_v32 = vsel %vm440_vm3, %v439_v25, %v433_v5  ;;  %v441_v33 = vsel %vm440_vm3, %v437_v27, %v439_v25  ;;  %v442_v35 = vsel %vm440_vm3, %v435_v63, %v437_v27  ;;  %v1204_v27 = vld [vmem:[%s1876_s1 + $0x7] ss:$8 sm:$0xf] }
  0xa1   : > { %v468_v37 = vmul.f32 %v1510_v8, %v444_v32  ;;  %v470_v38 = vmul.f32 %v1513_v9, %v442_v35  ;;  %v471_v39 = vmul.f32 %v1520_v17, %v441_v33  ;;  %678 = vmatprep.subr.bf16.mxu0 %v637_v28  ;;  %v1203_v28 = vld [vmem:[%s1876_s1 + $0x6] ss:$8 sm:$0xf] }
  0xa2   : > { %v1580_v32 = vrot.slane %v1203_v28, %v1416_v11 }
  0xa3   : > { %v475_v41 = vpop.permute.xlu1 %474  ;;  %v473_v42 = vpop.permute.xlu0 %472  ;;  %v636_v43 = vpack.c.bf16 %v468_v37, %v428_v24  ;;  %v639_v44 = vpack.c.bf16 %v471_v39, %v431_v36  ;;  %v638_v45 = vpack.c.bf16 %v470_v38, %v430_v31  ;;  %v1577_v31 = vrot.slane %v1203_v28, %v1429_v18 }
  0xa4   : > { %v483_v48 = vsel %vm480_vm4, %v473_v42, %v475_v41  ;;  %v1585_v37 = vrot.slane %v1203_v28, %v1427_v16  ;;  %v1590_v39 = vrot.slane %v1204_v27, %v1425_v14 }
  0xa5   : > { %679 = vmatpush1.bf16.msra.mxu0 %v636_v43  ;;  %719 = vmatprep.subr.bf16.mxu1 %v639_v44  ;;  %v508_v53 = vmul.f32 %v1541_v46, %v483_v48  ;;  %v1601_v43 = vrot.slane %v1204_v27, %v1416_v11  ;;  %v1604_v44 = vrot.slane %v1204_v27, %v1427_v16 }
  0xa6   : > { %720 = vmatpush1.bf16.msra.mxu1 %v638_v45  ;;  %v1607_v45 = vrot.slane %v1203_v28, %v1425_v14 }
  0xa7   : > { %v479_v51 = vpop.permute.xlu1 %478  ;;  %v477_v52 = vpop.permute.xlu0 %476  ;;  %v640_v21 = vpack.c.bf16 %v508_v53, %v1337_v1 }
  0xa8   : > { %v484_v54 = vsel %vm480_vm4, %v479_v51, %v473_v42  ;;  %v481_v55 = vsel %vm480_vm4, %v477_v52, %v479_v51  ;;  %v482_v56 = vsel %vm480_vm4, %v475_v41, %v477_v52  ;;  %v1598_v42 = vrot.slane %v1204_v27, %v1429_v18 }
  0xa9   : > { %v511_v59 = vmul.f32 %v1544_v47, %v484_v54  ;;  %v509_v63 = vmul.f32 %v1549_v49, %v482_v56  ;;  %v510_v5 = vmul.f32 %v1552_v50, %v481_v55  ;;  %v1617_v56 = vrot.slane %v1205_v40, %v1425_v14 }
  0xab   : > { %v515_v6 = vpop.permute.xlu1 %514  ;;  %v513_v7 = vpop.permute.xlu0 %512  ;;  %v641_v12 = vpack.c.bf16 %v509_v63, %v1345_v3  ;;  %v643_v13 = vpack.c.bf16 %v511_v59, %v1343_v2  ;;  %v642_v15 = vpack.c.bf16 %v510_v5, %v1335_v0 }
  0xac   : > { %v523_v51 = vsel %vm520_vm6, %v513_v7, %v515_v6 }
  0xad   : > { %680 = vmatprep.subr.bf16.mxu0 %v641_v12  ;;  %721 = vmatprep.subr.bf16.mxu1 %v643_v13 }
  0xae   : > { %681 = vmatpush1.bf16.msra.mxu0 %v640_v21  ;;  %722 = vmatpush1.bf16.msra.mxu1 %v642_v15  ;;  %v548_v15 = vmul.f32 %v1607_v45, %v523_v51 }
  0xaf   : > { %v519_v24 = vpop.permute.xlu1 %518  ;;  %v517_v25 = vpop.permute.xlu0 %516 }
  0xb0   : > { %v524_v36 = vsel %vm520_vm6, %v519_v24, %v513_v7  ;;  %v522_v38 = vsel %vm520_vm6, %v515_v6, %v517_v25  ;;  %v521_v48 = vsel %vm520_vm6, %v517_v25, %v519_v24 }
  0xb1   : > { %v551_v52 = vmul.f32 %v1577_v31, %v524_v36  ;;  %v549_v53 = vmul.f32 %v1580_v32, %v522_v38  ;;  %v550_v7 = vmul.f32 %v1585_v37, %v521_v48  ;;  %v1641_v48 = vrot.slane %v1205_v40, %v1427_v16 }
  0xb3   : > { %v555_v33 = vpop.permute.xlu1 %554  ;;  %v553_v35 = vpop.permute.xlu0 %552 }
  0xb4   : > { %v563_v41 = vsel %vm560_vm5, %v553_v35, %v555_v33 }
  0xb5   : > { %v588_v59 = vmul.f32 %v1590_v39, %v563_v41  ;;  %v1638_v41 = vrot.slane %v1205_v40, %v1416_v11 }
  0xb7   : > { %v559_v54 = vpop.permute.xlu1 %558  ;;  %v557_v55 = vpop.permute.xlu0 %556  ;;  %v644_v36 = vpack.c.bf16 %v588_v59, %v548_v15 }
  0xb8   : > { %v564_v63 = vsel %vm560_vm5, %v559_v54, %v553_v35  ;;  %v561_v5 = vsel %vm560_vm5, %v557_v55, %v559_v54  ;;  %v562_v6 = vsel %vm560_vm5, %v555_v33, %v557_v55  ;;  %v1634_v33 = vrot.slane %v1205_v40, %v1429_v18 }
  0xb9   : > { %v591_v12 = vmul.f32 %v1598_v42, %v564_v63  ;;  %v589_v13 = vmul.f32 %v1601_v43, %v562_v6  ;;  %v590_v14 = vmul.f32 %v1604_v44, %v561_v5 }
  0xbb   : > { %v595_v21 = vpop.permute.xlu1 %594  ;;  %v593_v24 = vpop.permute.xlu0 %592  ;;  %v645_v25 = vpack.c.bf16 %v589_v13, %v549_v53  ;;  %v647_v27 = vpack.c.bf16 %v591_v12, %v551_v52  ;;  %v646_v28 = vpack.c.bf16 %v590_v14, %v550_v7  ;;  %v652_v12 = vld [vmem:[%s1877_s2] sm:$0xf] }
  0xbc   : > { %v603_v35 = vsel %vm600_vm7, %v593_v24, %v595_v21 }
  0xbd   : > { %v628_v38 = vmul.f32 %v1617_v56, %v603_v35  ;;  %682 = vmatprep.subr.bf16.mxu0 %v645_v25  ;;  %723 = vmatprep.subr.bf16.mxu1 %v647_v27 }
  0xbe   : > { %683 = vmatpush1.bf16.msra.mxu0 %v644_v36  ;;  %724 = vmatpush1.bf16.msra.mxu1 %v646_v28 }
  0xbf   : > { %v599_v51 = vpop.permute.xlu1 %598  ;;  %v597_v52 = vpop.permute.xlu0 %596  ;;  %v648_v55 = vpack.c.bf16 %v628_v38, %v628_v38 }
  0xc0   : > { %v604_v53 = vsel %vm600_vm7, %v599_v51, %v593_v24  ;;  %v601_v18 = vsel %vm600_vm7, %v597_v52, %v599_v51  ;;  %v602_v54 = vsel %vm600_vm7, %v595_v21, %v597_v52 }
  0xc1   : > { %v631_v11 = vmul.f32 %v1634_v33, %v604_v53  ;;  %v629_v59 = vmul.f32 %v1638_v41, %v602_v54  ;;  %v630_v16 = vmul.f32 %v1641_v48, %v601_v18  ;;  %v665_v6 = vsel %vm663_vm8, %v648_v55, 0 }
  0xc3   : > { %v651_v40 = vpack.c.bf16 %v631_v11, %v631_v11  ;;  %v649_v63 = vpack.c.bf16 %v629_v59, %v629_v59  ;;  %v650_v5 = vpack.c.bf16 %v630_v16, %v630_v16  ;;  %v911_v11 = vld [vmem:[%s1880_s5] sm:$0xff] }
  0xc4   : > { %v1019_v59 = vld [vmem:[%s1882_s7] sm:$0xff] }
  0xc5   : > { %1206 = vmatprep.subr.msk.bf16.mxu0 %vm663_vm8, %v649_v63  ;;  %1208 = vmatprep.subr.msk.bf16.mxu1 %vm663_vm8, %v651_v40  ;;  %v671_v7 = vsel %vm663_vm8, %v650_v5, 0 }
  0xc6   : > { %685 = vmatpush1.bf16.msra.mxu0 %v665_v6  ;;  %726 = vmatpush1.bf16.msra.mxu1 %v671_v7 }
  0xc9   : > { %1207 = vmatmul.mubr.msk.bf16.vlgmr.msra.gmra.mrb[0].mxu0 %vm659_vm9, %v652_v12  ;;  %1209 = vmatmul.mubr.msk.bf16.vlgmr.msra.gmra.mrb[0].mxu1 %vm659_vm9, %v652_v12 }
  0xca   : > { %964 = vmatprep.mubr.bf16.mxu0 %v1272_v4  ;;  %1005 = vmatprep.mubr.bf16.mxu1 %v1272_v4 }
  0xd0   : > { %v657_v13 = vpop.permute.xlu0 %656 }
 0x19c   : > { %v710_v14 = vpop.f32.mrb[0].mxu0  ;;  %v751_v15 = vpop.f32.mrb[0].mxu1 }
 0x19d   : > { %v711_v21 = vadd.f32 %v710_v14, %v657_v13  ;;  %v752_v24 = vadd.f32 %v751_v15, %v657_v13  ;;  %v712_v25 = vpop.f32.mrb[1].mxu0  ;;  %v753_v27 = vpop.f32.mrb[1].mxu1 }
 0x19e   : > { %v714_v28 = vpop.f32.mrb[2].mxu0  ;;  %v755_v35 = vpop.f32.mrb[2].mxu1  ;;  %v713_v51 = vadd.f32 %v712_v25, %v657_v13  ;;  %v754_v54 = vadd.f32 %v753_v27, %v657_v13 }
 0x19f   : > { %v1663_v36 = vmax.f32 %v711_v21, 0.0  ;;  %v1665_v38 = vmax.f32 %v752_v24, 0.0  ;;  %v715_v52 = vpop.f32.mrb[3].mxu0  ;;  %v756_v53 = vpop.f32.mrb[3].mxu1 }
 0x1a0   : > { %v1671_v18 = vmax.f32 %v713_v51, 0.0  ;;  %v1677_v55 = vmax.f32 %v754_v54, 0.0 }
 0x1a1   : > { %766 = vrot.lane.b32.xlu0 %v1665_v38, %s1265_s11  ;;  %762 = vrot.lane.b32.xlu1 %v1663_v36, %s1265_s11 }
 0x1a5   : > { %778 = vrot.lane.b32.xlu0 %v1663_v36, %s1266_s12  ;;  %764 = vrot.lane.b32.xlu1 %v1671_v18, %s1265_s11 }
 0x1a9   : > { %782 = vrot.lane.b32.xlu0 %v1665_v38, %s1266_s12  ;;  %768 = vrot.lane.b32.xlu1 %v1677_v55, %s1265_s11 }
 0x1ad   : > { %794 = vrot.lane.b32.xlu0 %v1663_v36, %s1267_s13  ;;  %780 = vrot.lane.b32.xlu1 %v1671_v18, %s1266_s12 }
 0x1b1   : > { %798 = vrot.lane.b32.xlu0 %v1665_v38, %s1267_s13  ;;  %784 = vrot.lane.b32.xlu1 %v1677_v55, %s1266_s12 }
 0x1b5   : > { %810 = vrot.lane.b32.xlu0 %v1663_v36, %s1268_s14  ;;  %796 = vrot.lane.b32.xlu1 %v1671_v18, %s1267_s13 }
 0x1b9   : > { %814 = vrot.lane.b32.xlu0 %v1665_v38, %s1268_s14  ;;  %800 = vrot.lane.b32.xlu1 %v1677_v55, %s1267_s13 }
 0x1bd   : > { %826 = vrot.lane.b32.xlu0 %v1663_v36, %s1269_s15  ;;  %812 = vrot.lane.b32.xlu1 %v1671_v18, %s1268_s14 }
 0x1c1   : > { %830 = vrot.lane.b32.xlu0 %v1665_v38, %s1269_s15  ;;  %816 = vrot.lane.b32.xlu1 %v1677_v55, %s1268_s14 }
 0x1c5   : > { %842 = vrot.lane.b32.xlu0 %v1663_v36, %s1270_s16  ;;  %828 = vrot.lane.b32.xlu1 %v1671_v18, %s1269_s15 }
 0x1c9   : > { %846 = vrot.lane.b32.xlu0 %v1665_v38, %s1270_s16  ;;  %832 = vrot.lane.b32.xlu1 %v1677_v55, %s1269_s15 }
 0x1cd   : > { %858 = vrot.lane.b32.xlu0 %v1663_v36, %s1271_s17  ;;  %844 = vrot.lane.b32.xlu1 %v1671_v18, %s1270_s16 }
 0x1d1   : > { %862 = vrot.lane.b32.xlu0 %v1665_v38, %s1271_s17  ;;  %848 = vrot.lane.b32.xlu1 %v1677_v55, %s1270_s16 }
 0x1d5   : > { %874 = vrot.lane.b32.xlu0 %v1663_v36, %s1273_s18  ;;  %860 = vrot.lane.b32.xlu1 %v1671_v18, %s1271_s17 }
 0x1d9   : > { %878 = vrot.lane.b32.xlu0 %v1665_v38, %s1273_s18  ;;  %864 = vrot.lane.b32.xlu1 %v1677_v55, %s1271_s17 }
 0x1dd   : > { %914 = vperm.xlu0 %1255, %v911_v11   ;;  %876 = vrot.lane.b32.xlu1 %v1671_v18, %s1273_s18 }
 0x1e1   : > { %880 = vrot.lane.b32.xlu1 %v1677_v55, %s1273_s18 }
 0x1e5   : > { %1022 = vperm.xlu1 %1256, %v1019_v59  }
 0x213   : > { %v767_v16 = vpop.permute.xlu0 %766  ;;  %v763_v40 = vpop.permute.xlu1 %762 }
 0x217   : > { %v779_v63 = vpop.permute.xlu0 %778  ;;  %v765_v5 = vpop.permute.xlu1 %764 }
 0x218   : > { %v772_v12 = vsel %vm321_vm0, %v763_v40, %v765_v5  ;;  %v771_v35 = vsel %vm321_vm0, %v765_v5, %v767_v16 }
 0x219   : > { %v775_v21 = vmul.f32 %v772_v12, %v1433_v19 }
 0x21b   : > { %v783_v6 = vpop.permute.xlu0 %782  ;;  %v769_v7 = vpop.permute.xlu1 %768 }
 0x21c   : > { %v770_v27 = vsel %vm321_vm0, %v767_v16, %v769_v7  ;;  %v773_v28 = vsel %vm321_vm0, %v769_v7, %v763_v40  ;;  %v776_v16 = vmul.f32 %v771_v35, %v1444_v23 }
 0x21d   : > { %v774_v11 = vmul.f32 %v773_v28, %v1441_v22  ;;  %v777_v59 = vmul.f32 %v770_v27, %v1457_v30 }
 0x21f   : > { %v795_v13 = vpop.permute.xlu0 %794  ;;  %v781_v14 = vpop.permute.xlu1 %780 }
 0x220   : > { %v788_v15 = vsel %vm360_vm1, %v779_v63, %v781_v14  ;;  %v787_v24 = vsel %vm360_vm1, %v781_v14, %v783_v6 }
 0x221   : > { %v791_v25 = vmul.f32 %v788_v15, %v1436_v20  ;;  %v792_v54 = vmul.f32 %v787_v24, %v1454_v29 }
 0x223   : > { %v799_v51 = vpop.permute.xlu0 %798  ;;  %v785_v52 = vpop.permute.xlu1 %784  ;;  %v891_v53 = vpack.c.bf16 %v791_v25, %v775_v21  ;;  %v892_v15 = vpack.c.bf16 %v792_v54, %v776_v16 }
 0x224   : > { %v786_v19 = vsel %vm360_vm1, %v783_v6, %v785_v52  ;;  %v789_v20 = vsel %vm360_vm1, %v785_v52, %v779_v63 }
 0x225   : > { %v790_v40 = vmul.f32 %v789_v20, %v1447_v26  ;;  %v793_v7 = vmul.f32 %v786_v19, %v1464_v34  ;;  %932 = vmatprep.subr.bf16.mxu0 %v891_v53 }
 0x227   : > { %v890_v5 = vpack.c.bf16 %v790_v40, %v774_v11  ;;  %v811_v12 = vpop.permute.xlu0 %810  ;;  %v797_v29 = vpop.permute.xlu1 %796  ;;  %v893_v14 = vpack.c.bf16 %v793_v7, %v777_v59 }
 0x228   : > { %v804_v22 = vsel %vm400_vm2, %v795_v13, %v797_v29  ;;  %v803_v28 = vsel %vm400_vm2, %v797_v29, %v799_v51 }
 0x229   : > { %933 = vmatpush1.bf16.msra.mxu0 %v890_v5  ;;  %973 = vmatprep.subr.bf16.mxu1 %v893_v14  ;;  %v807_v23 = vmul.f32 %v804_v22, %v1488_v57 }
 0x22a   : > { %974 = vmatpush1.bf16.msra.mxu1 %v892_v15 }
 0x22b   : > { %v815_v63 = vpop.permute.xlu0 %814  ;;  %v801_v6 = vpop.permute.xlu1 %800 }
 0x22c   : > { %v802_v25 = vsel %vm400_vm2, %v799_v51, %v801_v6  ;;  %v805_v27 = vsel %vm400_vm2, %v801_v6, %v795_v13  ;;  %v808_v51 = vmul.f32 %v803_v28, %v1500_v61 }
 0x22d   : > { %v806_v19 = vmul.f32 %v805_v27, %v1497_v60  ;;  %v809_v20 = vmul.f32 %v802_v25, %v1503_v62 }
 0x22f   : > { %v827_v30 = vpop.permute.xlu0 %826  ;;  %v813_v26 = vpop.permute.xlu1 %812 }
 0x230   : > { %v820_v34 = vsel %vm440_vm3, %v811_v12, %v813_v26  ;;  %v819_v21 = vsel %vm440_vm3, %v813_v26, %v815_v63 }
 0x231   : > { %v823_v24 = vmul.f32 %v820_v34, %v1492_v58  ;;  %v824_v54 = vmul.f32 %v819_v21, %v1513_v9 }
 0x233   : > { %v831_v35 = vpop.permute.xlu0 %830  ;;  %v817_v52 = vpop.permute.xlu1 %816  ;;  %v895_v53 = vpack.c.bf16 %v823_v24, %v807_v23  ;;  %v896_v16 = vpack.c.bf16 %v824_v54, %v808_v51 }
 0x234   : > { %v818_v57 = vsel %vm440_vm3, %v815_v63, %v817_v52  ;;  %v821_v58 = vsel %vm440_vm3, %v817_v52, %v811_v12 }
 0x235   : > { %v822_v13 = vmul.f32 %v821_v58, %v1510_v8  ;;  %v825_v11 = vmul.f32 %v818_v57, %v1520_v17  ;;  %934 = vmatprep.subr.bf16.mxu0 %v895_v53 }
 0x237   : > { %v894_v59 = vpack.c.bf16 %v822_v13, %v806_v19  ;;  %v843_v40 = vpop.permute.xlu0 %842  ;;  %v829_v9 = vpop.permute.xlu1 %828  ;;  %v897_v7 = vpack.c.bf16 %v825_v11, %v809_v20 }
 0x238   : > { %v835_v5 = vsel %vm480_vm4, %v829_v9, %v831_v35  ;;  %v836_v60 = vsel %vm480_vm4, %v827_v30, %v829_v9  ;;  %v1014_v9 = vpack.c.bf16 %v1337_v1, %v1337_v1  ;;  %v1017_v1 = vpack.c.bf16 %v1343_v2, %v1343_v2 }
 0x239   : > { %v838_v62 = vmul.f32 %v836_v60, %v1541_v46  ;;  %v839_v8 = vmul.f32 %v835_v5, %v1549_v49  ;;  %935 = vmatpush1.bf16.msra.mxu0 %v894_v59  ;;  %975 = vmatprep.subr.bf16.mxu1 %v897_v7 }
 0x23a   : > { %976 = vmatpush1.bf16.msra.mxu1 %v896_v16  ;;  %v1030_v10 = vsel %vm663_vm8, %v1014_v9, 0 }
 0x23b   : > { %v898_v61 = vpack.c.bf16 %v838_v62, %v1663_v36  ;;  %v847_v17 = vpop.permute.xlu0 %846  ;;  %v833_v12 = vpop.permute.xlu1 %832  ;;  %v899_v29 = vpack.c.bf16 %v839_v8, %v1671_v18 }
 0x23c   : > { %v834_v14 = vsel %vm480_vm4, %v831_v35, %v833_v12  ;;  %v837_v15 = vsel %vm480_vm4, %v833_v12, %v827_v30 }
 0x23d   : > { %v840_v63 = vmul.f32 %v834_v14, %v1552_v50  ;;  %v841_v46 = vmul.f32 %v837_v15, %v1544_v47  ;;  %936 = vmatprep.subr.bf16.mxu0 %v899_v29 }
 0x23e   : > { %937 = vmatpush1.bf16.msra.mxu0 %v898_v61 }
 0x23f   : > { %v900_v49 = vpack.c.bf16 %v840_v63, %v1665_v38  ;;  %v859_v6 = vpop.permute.xlu0 %858  ;;  %v845_v36 = vpop.permute.xlu1 %844  ;;  %v901_v22 = vpack.c.bf16 %v841_v46, %v1677_v55 }
 0x240   : > { %v851_v34 = vsel %vm520_vm6, %v845_v36, %v847_v17  ;;  %v852_v50 = vsel %vm520_vm6, %v843_v40, %v845_v36 }
 0x241   : > { %977 = vmatprep.subr.bf16.mxu1 %v901_v22  ;;  %v854_v23 = vmul.f32 %v852_v50, %v1607_v45  ;;  %v855_v55 = vmul.f32 %v851_v34, %v1580_v32 }
 0x242   : > { %978 = vmatpush1.bf16.msra.mxu1 %v900_v49 }
 0x243   : > { %v863_v18 = vpop.permute.xlu0 %862  ;;  %v849_v26 = vpop.permute.xlu1 %848 }
 0x244   : > { %v850_v27 = vsel %vm520_vm6, %v847_v17, %v849_v26  ;;  %v853_v28 = vsel %vm520_vm6, %v849_v26, %v843_v40  ;;  %v1015_v40 = vpack.c.bf16 %v1345_v3, %v1345_v3  ;;  %v910_v3 = vld [vmem:[%s1879_s4] sm:$0xf] }
 0x245   : > { %v856_v45 = vmul.f32 %v850_v27, %v1585_v37 }
 0x247   : > { %v861_v30 = vpop.permute.xlu1 %860  ;;  %v875_v21 = vpop.permute.xlu0 %874 }
 0x248   : > { %v867_v47 = vsel %vm560_vm5, %v861_v30, %v863_v18  ;;  %v868_v38 = vsel %vm560_vm5, %v859_v6, %v861_v30 }
 0x249   : > { %v870_v24 = vmul.f32 %v868_v38, %v1590_v39  ;;  %v871_v25 = vmul.f32 %v867_v47, %v1601_v43  ;;  %v857_v39 = vmul.f32 %v853_v28, %v1577_v31 }
 0x24b   : > { %v902_v35 = vpack.c.bf16 %v870_v24, %v854_v23  ;;  %v865_v52 = vpop.permute.xlu1 %864  ;;  %v903_v53 = vpack.c.bf16 %v871_v25, %v855_v55  ;;  %v879_v58 = vpop.permute.xlu0 %878 }
 0x24c   : > { %v866_v54 = vsel %vm560_vm5, %v863_v18, %v865_v52  ;;  %v869_v32 = vsel %vm560_vm5, %v865_v52, %v859_v6 }
 0x24d   : > { %v872_v43 = vmul.f32 %v866_v54, %v1604_v44  ;;  %v873_v57 = vmul.f32 %v869_v32, %v1598_v42  ;;  %938 = vmatprep.subr.bf16.mxu0 %v903_v53 }
 0x24e   : > { %939 = vmatpush1.bf16.msra.mxu0 %v902_v35 }
 0x24f   : > { %v904_v19 = vpack.c.bf16 %v872_v43, %v856_v45  ;;  %v877_v20 = vpop.permute.xlu1 %876  ;;  %v905_v13 = vpack.c.bf16 %v873_v57, %v857_v39 }
 0x250   : > { %v883_v11 = vsel %vm600_vm7, %v877_v20, %v879_v58  ;;  %v884_v51 = vsel %vm600_vm7, %v875_v21, %v877_v20 }
 0x251   : > { %v886_v37 = vmul.f32 %v884_v51, %v1617_v56  ;;  %v887_v31 = vmul.f32 %v883_v11, %v1638_v41  ;;  %979 = vmatprep.subr.bf16.mxu1 %v905_v13 }
 0x252   : > { %980 = vmatpush1.bf16.msra.mxu1 %v904_v19 }
 0x253   : > { %v906_v44 = vpack.c.bf16 %v886_v37, %v886_v37  ;;  %v907_v42 = vpack.c.bf16 %v887_v31, %v887_v31  ;;  %v881_v59 = vpop.permute.xlu1 %880 }
 0x254   : > { %v882_v7 = vsel %vm600_vm7, %v879_v58, %v881_v59  ;;  %v885_v16 = vsel %vm600_vm7, %v881_v59, %v875_v21 }
 0x255   : > { %v888_v56 = vmul.f32 %v882_v7, %v1641_v48  ;;  %v889_v41 = vmul.f32 %v885_v16, %v1634_v33  ;;  %1210 = vmatprep.subr.msk.bf16.mxu0 %vm663_vm8, %v907_v42  ;;  %v921_v5 = vsel %vm663_vm8, %v906_v44, 0  ;;  %v1016_v33 = vpack.c.bf16 %v1335_v0, %v1335_v0  ;;  %v1018_v0 = vld [vmem:[%s1881_s6] sm:$0xf] }
 0x256   : > { %941 = vmatpush1.bf16.msra.mxu0 %v921_v5 }
 0x257   : > { %v908_v60 = vpack.c.bf16 %v888_v56, %v888_v56  ;;  %v909_v62 = vpack.c.bf16 %v889_v41, %v889_v41  ;;  %1214 = vmatprep.subr.msk.bf16.mxu0 %vm663_vm8, %v1015_v40  ;;  %v1036_v2 = vsel %vm663_vm8, %v1016_v33, 0 }
 0x259   : > { %1211 = vmatmul.mubr.msk.bf16.vlgmr.msra.gmra.mrb[4].mxu0 %vm659_vm9, %v910_v3  ;;  %1212 = vmatprep.subr.msk.bf16.mxu1 %vm663_vm8, %v909_v62  ;;  %v927_v48 = vsel %vm663_vm8, %v908_v60, 0 }
 0x25a   : > { %982 = vmatpush1.bf16.msra.mxu1 %v927_v48  ;;  %1042 = vmatpush1.bf16.msra.mxu0 %v1030_v10 }
 0x25b   : > { %1216 = vmatprep.subr.msk.bf16.mxu1 %vm663_vm8, %v1017_v1  ;;  %1073 = vmatprep.mubr.bf16.mxu0 %v1272_v4 }
 0x25c   : > { %v915_v61 = vpop.permute.xlu0 %914 }
 0x25d   : > { %1213 = vmatmul.mubr.msk.bf16.vlgmr.msra.gmra.mrb[4].mxu1 %vm659_vm9, %v910_v3 }
 0x25e   : > { %1083 = vmatpush1.bf16.msra.mxu1 %v1036_v2  ;;  %1114 = vmatprep.mubr.bf16.mxu1 %v1272_v4 }
 0x264   : > { %v1023_v8 = vpop.permute.xlu1 %1022 }
 0x265   : > { %1215 = vmatmul.mubr.msk.bf16.vlgmr.msra.gmra.mrb[4].mxu0 %vm1025_vm10, %v1018_v0  ;;  %v1222_v17 = vadd.f32 %v1023_v8, %v915_v61 }
 0x269   : > { %1217 = vmatmul.mubr.msk.bf16.vlgmr.msra.gmra.mrb[4].mxu1 %vm1025_vm10, %v1018_v0 }
 0x338   : > { %v1075_v12 = vpop.f32.mrb[4].mxu0 }
 0x339   : > { %v1223_v29 = vadd.f32 %v1222_v17, %v1075_v12  ;;  %v1077_v14 = vpop.f32.mrb[5].mxu0 }
 0x33a   : > { %v1225_v15 = vadd.f32 %v1222_v17, %v1077_v14  ;;  %v1079_v4 = vpop.f32.mrb[6].mxu0 }
 0x33b   : > { %v1127_v63 = vmax.f32 %v1223_v29, 0.0  ;;  %v1080_v46 = vpop.f32.mrb[7].mxu0 }
 0x33c   : > { %v1128_v49 = vmax.f32 %v1225_v15, 0.0  ;;  %v1116_v6 = vpop.f32.mrb[4].mxu1 }
 0x33d   : > { %1131 = vst [vmem:[%s305_s19] sm:$0xff] %v1127_v63  ;;  %v1227_v36 = vadd.f32 %v1222_v17, %v1116_v6  ;;  %v1118_v22 = vpop.f32.mrb[5].mxu1 }
 0x33e   : > { %1132 = vst [vmem:[%s305_s19 + $0x8] sm:$0xff] %v1128_v49  ;;  %v1229_v18 = vadd.f32 %v1222_v17, %v1118_v22  ;;  %v1120_v26 = vpop.f32.mrb[6].mxu1 }
 0x33f   : > { %v1129_v34 = vmax.f32 %v1227_v36, 0.0  ;;  %v1121_v50 = vpop.f32.mrb[7].mxu1 }
 0x340   : > { %v1130_v30 = vmax.f32 %v1229_v18, 0.0 }
 0x341   : > { %1133 = vst [vmem:[%s305_s19 + $0x10] sm:$0xff] %v1129_v34 }
 0x342   : > { %1134 = vst [vmem:[%s305_s19 + $0x18] sm:$0xff] %v1130_v30 }
 0x343 PF: > { %s18_s27 = sadd.s32 1, %s1263_s27  }
 0x344   : > { %p15_p4 = scmp.ge.s32.totalorder %s18_s27, 4  }
 0x346   :  { %17 = sbr.rel (!%p15_p4) target bundleno = 1 (0x1), region = 89 }

</bundles_post_ra>
